<compile_context>
chip_gen: v5e
topology: v5e:2x2
jax: 0.10.0
libtpu: 0.0.40
codegen_flags: <defaults>
</compile_context>

<pallas_src>
import jax
import jax.numpy as jnp
from jax.experimental import pallas as pl
from jax.experimental.pallas import tpu as pltpu


def _round_up(v: int, m: int) -> int:
    return (v + m - 1) // m * m


def _pad_and_tile(dim: int, base: int, tile_cap: int):
    """Pad `dim` to a multiple of `base`; pick the largest tile <= tile_cap
    (a multiple of `base`) that exactly divides the padded dim.  Never rounds
    the padded dim up to a multiple of tile_cap (avoids ~2x zero traffic)."""
    p = _round_up(dim, base)
    if p <= tile_cap:
        return p, p
    best = base
    t = base
    while t <= tile_cap:
        if p % t == 0:
            best = t
        t += base
    return p, best


def _pick_rows(rows: int, mult: int, cap: int):
    """Padded per-group row count + M tile (second-to-last dim of x / out)."""
    p = _round_up(rows, mult)
    if p <= cap:
        return p, p
    for t in range(cap, 0, -mult):          # prefer an exact-divisor tile
        if p % t == 0 and t >= cap // 2:
            return p, t
    return _round_up(p, cap), cap


def _select_indices(op: int, num_domains: int):
    """Which linear layer each domain-chunk uses (mirrors the PyTorch logic)."""
    full = (1 << num_domains) - 1
    if op == full:
        return [1 << i for i in range(num_domains)]
    return [op if ((1 << i) & op) else (1 << i) for i in range(num_domains)]


def _group_domains(sel):
    """Group domains sharing a layer so each weight panel streams once."""
    groups = []          # list of (layer_id, [domain indices])
    where = {}
    for d, layer in enumerate(sel):
        if layer in where:
            groups[where[layer]][1].append(d)
        else:
            where[layer] = len(groups)
            groups.append((layer, [d]))
    return groups


def _chip_budget():
    """(vmem_limit_bytes, TM_cap, TK_cap, TN_cap), derived from physical VMEM."""
    try:
        info = pltpu.get_tpu_info()
        phys = getattr(info, "vmem_capacity_bytes", 128 * 1024 * 1024)
    except Exception:                         # conservative fallback
        phys = 64 * 1024 * 1024
    if phys <= 64 * 1024 * 1024:              # v7x-class: 64 MiB physical
        return 32 * 1024 * 1024, 256, 512, 1024
    # v5e / v6e: 128 MiB physical -> spend more VMEM on bigger TK/TN tiles.
    # (TM=128 would be marginally better on v5e; 256 is fine everywhere.)
    return 64 * 1024 * 1024, 256, 1024, 2048


def _make_kernel(accumulate_in_output: bool):
    if accumulate_in_output:
        # f32 output: accumulate straight into o_ref (saves the (TM,TN) f32
        # scratch and the finalize copy pass).  Bias-initialized at k==0.
        def kernel(sel_ref, x_ref, w_ref, b_ref, o_ref):
            del sel_ref
            k = pl.program_id(3)

            @pl.when(k == 0)
            def _init():
                o_ref[...] = jnp.broadcast_to(b_ref[0:1, :], o_ref.shape)

            o_ref[...] += jnp.dot(x_ref[...], w_ref[...],
                                  preferred_element_type=jnp.float32)
        return kernel

    def kernel(sel_ref, x_ref, w_ref, b_ref, o_ref, acc_ref):
        del sel_ref
        k = pl.program_id(3)

        @pl.when(k == 0)
        def _init():
            acc_ref[...] = jnp.broadcast_to(b_ref[0:1, :], acc_ref.shape)

        acc_ref[...] += jnp.dot(x_ref[...], w_ref[...],
                                preferred_element_type=jnp.float32)

        @pl.when(k == pl.num_programs(3) - 1)
        def _finalize():
            o_ref[...] = acc_ref[...].astype(o_ref.dtype)
    return kernel


def ds_classifier_forward(x, w_stack, b_stack, op: int, num_domains: int,
                          *, compute_dtype=jnp.bfloat16):
    """x: (B, F); w_stack: (2^D, C, F); b_stack: (2^D, C). Returns (B, C).

    compute_dtype: MXU input dtype for x/W (f32 accumulation always kept).
    Default bf16 per perf review; pass jnp.float32 for exact f32 semantics.
    """
    B, F = x.shape
    n_layers, C, Fw = w_stack.shape
    assert Fw == F and n_layers == (1 << num_domains)
    # TODO(synk): torch.chunk allows a ragged last chunk; we require even split.
    assert B % num_domains == 0, "batch must chunk evenly across domains"
    chunk = B // num_domains
    out_dtype = x.dtype

    if compute_dtype is None:
        compute_dtype = x.dtype
    compute_dtype = jnp.dtype(compute_dtype)
    x = x.astype(compute_dtype)
    w_stack = w_stack.astype(compute_dtype)
    # TODO(synk): int8 (v5e/v6e) / fp8-e4m3 (v7x) weight paths with per-channel
    # scales folded into the finalize are not implemented.

    # --- group domain-chunks sharing a weight layer (dedup weight streaming).
    sel = _select_indices(op, num_domains)
    groups = _group_domains(sel)
    n_groups = len(groups)
    max_rows = max(len(dl) for _, dl in groups) * chunk

    vmem_limit, tm_cap, tk_cap, tn_cap = _chip_budget()
    # Sublane packing multiple: 8 (f32), 16 (bf16), 32 (int8/fp8).
    row_mult = max(8, 32 // compute_dtype.itemsize)
    tm_cap = _round_up(tm_cap, row_mult)

    F_p, TK = _pad_and_tile(F, 128, tk_cap)   # TK == F_p when it fits: K collapses
    C_p, TN = _pad_and_tile(C, 128, tn_cap)
    rows_p, TM = _pick_rows(max_rows, row_mult, tm_cap)

    # Activations: (n_groups, rows_p, F_p), each group = its domains' chunks
    # concatenated along rows, zero-padded.
    x3 = x.reshape(num_domains, chunk, F)
    xg = []
    for _, dlist in groups:
        parts = [x3[d] for d in dlist]
        g = jnp.concatenate(parts, axis=0) if len(parts) > 1 else parts[0]
        xg.append(jnp.pad(g, ((0, rows_p - g.shape[0]), (0, F_p - F))))
    x_g = jnp.stack(xg)

    # Weights pre-transposed ONCE to (2^D, F_p, C_p): no in-kernel transpose.
    w_t = jnp.swapaxes(w_stack, 1, 2)
    w_t = jnp.pad(w_t, ((0, 0), (0, F_p - F), (0, C_p - C)))
    # Bias replicated to 8 sublanes -> (8,128)-legal BlockSpec on every gen.
    b_p = jnp.pad(b_stack.astype(jnp.float32), ((0, 0), (0, C_p - C)))
    b_p = jnp.tile(b_p[:, None, :], (1, 8, 1))            # (2^D, 8, C_p)

    layer_ids = jnp.asarray([lid for lid, _ in groups], dtype=jnp.int32)

    n_m, n_n, n_k = rows_p // TM, C_p // TN, F_p // TK

    accumulate_in_output = (jnp.dtype(out_dtype) == jnp.float32)
    scratch_shapes = () if accumulate_in_output else (
        pltpu.VMEM((TM, TN), jnp.float32),)

    # Deeper buffering on the weight stream only pays with enough K steps.
    w_spec_kwargs = {"pipeline_mode": pl.Buffered(3)} if n_k >= 4 else {}

    grid_spec = pltpu.PrefetchScalarGridSpec(
        num_scalar_prefetch=1,
        grid=(n_groups, n_m, n_n, n_k),
        in_specs=[
            # activation tile (TM, TK); note: re-streamed per N-tile (n_n is
            # usually 1 for classifier-head C, so this is typically free).
            pl.BlockSpec((pl.Squeezed(), TM, TK),
                         lambda g, m, n, k, ids: (g, m, k)),
            # selected (pre-transposed) weight tile (TK, TN)
            pl.BlockSpec((pl.Squeezed(), TK, TN),
                         lambda g, m, n, k, ids: (ids[g], k, n),
                         **w_spec_kwargs),
            # selected bias tile (8, TN), sublane-replicated
            pl.BlockSpec((pl.Squeezed(), 8, TN),
                         lambda g, m, n, k, ids: (ids[g], 0, n)),
        ],
        out_specs=pl.BlockSpec((pl.Squeezed(), TM, TN),
                               lambda g, m, n, k, ids: (g, m, n)),
        scratch_shapes=scratch_shapes,
    )

    itemsize = compute_dtype.itemsize
    cost = pl.CostEstimate(
        flops=2 * n_groups * rows_p * F_p * C_p,
        transcendentals=0,
        bytes_accessed=(n_groups * rows_p * F_p * itemsize * n_n     # x
                        + n_groups * n_m * F_p * C_p * itemsize      # weights
                        + n_groups * 8 * C_p * 4                     # bias
                        + n_groups * rows_p * C_p
                        * jnp.dtype(out_dtype).itemsize),            # out
    )

    out_g = pl.pallas_call(
        _make_kernel(accumulate_in_output),
        out_shape=jax.ShapeDtypeStruct((n_groups, rows_p, C_p), out_dtype),
        grid_spec=grid_spec,
        compiler_params=pltpu.CompilerParams(
            dimension_semantics=("parallel", "parallel", "parallel",
                                 "arbitrary"),
            vmem_limit_bytes=vmem_limit,
        ),
        cost_estimate=cost,
    )(layer_ids, x_g, w_t, b_p)

    # Scatter group rows back to domain order and strip padding:
    # result == torch.cat(per-chunk outputs, 0).
    outs = [None] * num_domains
    for g, (_, dlist) in enumerate(groups):
        for j, d in enumerate(dlist):
            outs[d] = out_g[g, j * chunk:(j + 1) * chunk, :C]
    return jnp.concatenate(outs, axis=0)


def _reference_forward(x, w_stack, b_stack, op, num_domains):
    """Plain-JAX reference mirroring the PyTorch module."""
    B = x.shape[0]
    chunk = B // num_domains
    sel = _select_indices(op, num_domains)
    outs = []
    for d in range(num_domains):
        xc = x[d * chunk:(d + 1) * chunk]
        outs.append(xc @ w_stack[sel[d]].T + b_stack[sel[d]])
    return jnp.concatenate(outs, axis=0)


if __name__ == "__main__":
    # Small shapes consistent with the module: plain (B, F) -> (B, C) head.
    num_domains = 3
    num_features = 32
    num_classes = 16
    batch = 24                      # chunked into 3 pieces of 8 rows

    key = jax.random.PRNGKey(0)
    kx, kw, kb = jax.random.split(key, 3)

    x = jax.random.normal(kx, (batch, num_features), dtype=jnp.float32)
    n_layers = 1 << num_domains
    # PyTorch-Linear layout: (out_features, in_features).
    w_stack = 0.05 * jax.random.normal(
        kw, (n_layers, num_classes, num_features), dtype=jnp.float32)
    b_stack = 0.05 * jax.random.normal(
        kb, (n_layers, num_classes), dtype=jnp.float32)

    ok = True
    # Exercise both branches: test mode (op == 2^D - 1, all layers distinct)
    # and a partial op where two domains share layer `op` (dedup path).
    for op in [(1 << num_domains) - 1, 0b011]:
        ref = _reference_forward(x, w_stack, b_stack, op, num_domains)
        # exact f32 path
        out = jax.block_until_ready(
            ds_classifier_forward(x, w_stack, b_stack, op, num_domains,
                                  compute_dtype=jnp.float32))
        ok = ok and bool(jnp.allclose(out, ref, atol=1e-5, rtol=1e-5))
        # default bf16-MXU path (f32 accumulation)
        out_bf = jax.block_until_ready(
            ds_classifier_forward(x, w_stack, b_stack, op, num_domains))
        ok = ok and bool(jnp.allclose(out_bf, ref, atol=5e-2, rtol=5e-2))

    if ok:
        print("KERNEL_OK")
</pallas_src>

<mosaic_0001>
module attributes {stable_mosaic.version = 11 : i64} {
  func.func @kernel(%arg0: i32, %arg1: i32, %arg2: i32, %arg3: i32, %arg4: memref<3xi32, #tpu.memory_space<smem>>, %arg5: memref<1x8x128xf32, #tpu.memory_space<vmem>>, %arg6: memref<1x128x128xf32, #tpu.memory_space<vmem>>, %arg7: memref<1x8x128xf32, #tpu.memory_space<vmem>>, %arg8: memref<1x8x128xf32, #tpu.memory_space<vmem>>) attributes {dimension_semantics = [#tpu.dimension_semantics<parallel>, #tpu.dimension_semantics<parallel>, #tpu.dimension_semantics<parallel>, #tpu.dimension_semantics<arbitrary>], iteration_bounds = array<i64: 3, 1, 1, 1>, scalar_prefetch = 1 : i64, scratch_operands = 0 : i64, tpu.core_type = #tpu.core_type<tc>, window_params = [{transform_indices = @transform_0, window_bounds = array<i64: 1, 8, 128>}, {transform_indices = @transform_1, window_bounds = array<i64: 1, 128, 128>}, {transform_indices = @transform_2, window_bounds = array<i64: 1, 8, 128>}, {transform_indices = @transform_3, window_bounds = array<i64: 1, 8, 128>}]} {
    %c0_i32 = arith.constant 0 : i32
    %0 = arith.cmpi eq, %arg3, %c0_i32 : i32
    %1 = arith.extui %0 : i1 to i32
    %c0_i32_0 = arith.constant 0 : i32
    %2 = arith.cmpi ne, %1, %c0_i32_0 : i32
    scf.if %2 {
      %c0_12 = arith.constant 0 : index
      %c0_13 = arith.constant 0 : index
      %c0_14 = arith.constant 0 : index
      %14 = vector.load %arg7[%c0_12, %c0_13, %c0_14] : memref<1x8x128xf32, #tpu.memory_space<vmem>>, vector<1x1x128xf32>
      %15 = vector.shape_cast %14 : vector<1x1x128xf32> to vector<1x128xf32>
      %16 = vector.shape_cast %15 : vector<1x128xf32> to vector<1x128xf32>
      %17 = vector.broadcast %16 : vector<1x128xf32> to vector<8x128xf32>
      %c0_15 = arith.constant 0 : index
      %c0_16 = arith.constant 0 : index
      %c0_17 = arith.constant 0 : index
      %18 = vector.load %arg8[%c0_15, %c0_16, %c0_17] : memref<1x8x128xf32, #tpu.memory_space<vmem>>, vector<1x8x128xf32>
      %19 = vector.shape_cast %18 : vector<1x8x128xf32> to vector<8x128xf32>
      %20 = vector.shape_cast %17 : vector<8x128xf32> to vector<1x8x128xf32>
      tpu.vector_store %arg8[%c0_15, %c0_16, %c0_17], %20 {strides = array<i32>} : memref<1x8x128xf32, #tpu.memory_space<vmem>>, vector<1x8x128xf32>,
    } else {
    }
    %c0 = arith.constant 0 : index
    %c0_1 = arith.constant 0 : index
    %c0_2 = arith.constant 0 : index
    %3 = vector.load %arg8[%c0, %c0_1, %c0_2] : memref<1x8x128xf32, #tpu.memory_space<vmem>>, vector<1x8x128xf32>
    %4 = vector.shape_cast %3 : vector<1x8x128xf32> to vector<8x128xf32>
    %c0_3 = arith.constant 0 : index
    %c0_4 = arith.constant 0 : index
    %c0_5 = arith.constant 0 : index
    %5 = vector.load %arg5[%c0_3, %c0_4, %c0_5] : memref<1x8x128xf32, #tpu.memory_space<vmem>>, vector<1x8x128xf32>
    %6 = vector.shape_cast %5 : vector<1x8x128xf32> to vector<8x128xf32>
    %c0_6 = arith.constant 0 : index
    %c0_7 = arith.constant 0 : index
    %c0_8 = arith.constant 0 : index
    %7 = vector.load %arg6[%c0_6, %c0_7, %c0_8] : memref<1x128x128xf32, #tpu.memory_space<vmem>>, vector<1x128x128xf32>
    %8 = vector.shape_cast %7 : vector<1x128x128xf32> to vector<128x128xf32>
    %cst = arith.constant dense<0.000000e+00> : vector<8x128xf32>
    %9 = tpu.matmul %6, %8, %cst {dimension_numbers = #tpu.dot_dimension_numbers<[1], [0], [0], [1], [0, 0, 1, 1], [], []>} : vector<8x128xf32>, vector<128x128xf32>, vector<8x128xf32> -> vector<8x128xf32>
    %10 = arith.addf %4, %9 : vector<8x128xf32>
    %c0_9 = arith.constant 0 : index
    %c0_10 = arith.constant 0 : index
    %c0_11 = arith.constant 0 : index
    %11 = vector.load %arg8[%c0_9, %c0_10, %c0_11] : memref<1x8x128xf32, #tpu.memory_space<vmem>>, vector<1x8x128xf32>
    %12 = vector.shape_cast %11 : vector<1x8x128xf32> to vector<8x128xf32>
    %13 = vector.shape_cast %10 : vector<8x128xf32> to vector<1x8x128xf32>
    tpu.vector_store %arg8[%c0_9, %c0_10, %c0_11], %13 {strides = array<i32>} : memref<1x8x128xf32, #tpu.memory_space<vmem>>, vector<1x8x128xf32>,
    return
  }
  func.func @transform_0(%arg0: i32, %arg1: i32, %arg2: i32, %arg3: i32, %arg4: memref<3xi32, #tpu.memory_space<smem>>) -> (i32, i32, i32) {
    %c0_i32 = arith.constant 0 : i32
    return %arg0, %arg1, %arg3 : i32, i32, i32
  }
  func.func @transform_1(%arg0: i32, %arg1: i32, %arg2: i32, %arg3: i32, %arg4: memref<3xi32, #tpu.memory_space<smem>>) -> (i32, i32, i32) {
    %0 = arith.index_cast %arg0 : i32 to index
    %1 = memref.load %arg4[%0] : memref<3xi32, #tpu.memory_space<smem>>
    %c0_i32 = arith.constant 0 : i32
    return %1, %arg3, %arg2 : i32, i32, i32
  }
  func.func @transform_2(%arg0: i32, %arg1: i32, %arg2: i32, %arg3: i32, %arg4: memref<3xi32, #tpu.memory_space<smem>>) -> (i32, i32, i32) {
    %0 = arith.index_cast %arg0 : i32 to index
    %1 = memref.load %arg4[%0] : memref<3xi32, #tpu.memory_space<smem>>
    %c0_i32 = arith.constant 0 : i32
    %c0_i32_0 = arith.constant 0 : i32
    return %1, %c0_i32, %arg2 : i32, i32, i32
  }
  func.func @transform_3(%arg0: i32, %arg1: i32, %arg2: i32, %arg3: i32, %arg4: memref<3xi32, #tpu.memory_space<smem>>) -> (i32, i32, i32) {
    %c0_i32 = arith.constant 0 : i32
    return %arg0, %arg1, %arg2 : i32, i32, i32
  }
}

</mosaic_0001>

<bundles_post_ra>
// kernel: tpu_custom_call.1
= control target key start
LH: loop header
LB: loop body
LE: loop exit
PB: predicated region body
PF: predicated region fallthrough
CT: control target
= control target key end

     0   :  { %s928_s18 = smov [#allocation3]   ;;  %s1297_s0 = inlined_call_operand.hbm [shape: s32[3], index: 0, kind: input, shape index: {}]   ;;  %s1298_s1 = inlined_call_operand.hbm [shape: f32[3,8,128], index: 1, kind: input, shape index: {}]   ;;  %s1299_s2 = inlined_call_operand.hbm [shape: f32[8,128,128], index: 2, kind: input, shape index: {}]   ;;  %s1300_s3 = inlined_call_operand.hbm [shape: f32[8,8,128], index: 3, kind: input, shape index: {}]   ;;  %s1301_s4 = inlined_call_operand.hbm [shape: f32[3,8,128], index: 4, kind: output, shape index: {}]  }
   0x1   :  { %1309 = sst [smem:[#allocation27_spill]] %s1298_s1  ;;  %s10_s17 = sshll.u32 %s1297_s0, 4  ;;  %s11_s17 = int_to_ptr.hbm [resolvable:$true] %s10_s17 }
   0x2   :  { %1310 = sst [smem:[#allocation28_spill]] %s1299_s2 }
   0x3   :  { %1311 = sst [smem:[#allocation29_spill]] %s1301_s4 }
   0x4   :  { %13 = dma.hbm_to_smem %s11_s17, 16, %s928_s18, [#allocation2] }
   0x5   :  { %862 = dma.done.wait [#allocation2], 16 }
   0x6   :  { %863 = vsyncadd [#allocation2], 4294967280 }
   0x7   :  { %16 = sfence }
   0x8   :  { %17 = vsyncpa [#allocation5], 0 }
   0x9   :  { %19 = vsyncpa [#allocation5 + $0x1], 0 }
   0xa   :  { %20 = vsyncpa [#allocation8], 0 }
   0xb   :  { %22 = vsyncpa [#allocation8 + $0x1], 0 }
   0xc   :  { %23 = vsyncpa [#allocation6], 0 }
   0xd   :  { %25 = vsyncpa [#allocation6 + $0x1], 0  ;;  %s959_s19 = smov 0   ;;  %s961_s20 = smov 0  }
   0xe   :  { %s963_s21 = smov 0   ;;  %s965_s22 = smov 0  }
   0xf   :  { %s967_s0 = smov 0   ;;  %s969_s23 = smov 0  }
  0x10   :  { %s971_s24 = smov 0   ;;  %s973_s25 = smov 0  }
  0x11   :  { %s975_s26 = smov 0   ;;  %s977_s27 = smov 0  }
  0x12   :  { %s979_s28 = smov 0   ;;  %s981_s29 = smov 0  }
  0x13 LB: > { %1312 = sst [smem:[#allocation20_spill]] %s902_s23  ;;  %s57_s30 = sadd.s32 1, %s922_s28  ;;  %s926_s29 = sphi %s981_s29, %s31_s29   ;;  %s922_s28 = sphi %s979_s28, %s1343_s28   ;;  %s918_s27 = sphi %s977_s27, %s1342_s27   ;;  %s914_s26 = sphi %s975_s26, %s1341_s26   ;;  %s910_s25 = sphi %s973_s25, %s1350_s25   ;;  %s906_s24 = sphi %s971_s24, %s1349_s24   ;;  %s902_s23 = sphi %s969_s23, %s1339_s23   ;;  %s898_s0 = sphi %s967_s0, %s1348_s0   ;;  %s894_s22 = sphi %s965_s22, %s1347_s22   ;;  %s890_s21 = sphi %s963_s21, %s1346_s21   ;;  %s886_s20 = sphi %s961_s20, %s1345_s20   ;;  %s882_s19 = sphi %s959_s19, %s1344_s19  }
  0x14   : > { %1313 = sst [smem:[#allocation21_spill]] %s914_s26  ;;  %p76_p0 = scmp.eq.s32.totalorder %s926_s29, 0 }
  0x15   : > { %1314 = sst [smem:[#allocation22_spill]] %s922_s28  ;;  %p59_p1 = scmp.ge.s32.totalorder %s57_s30, 3 }
  0x16   : > { %s91_s5 = sld [smem:[#allocation3 + %s922_s28]]  ;;  %s100_s6 = sadd.s32 1, %s902_s23 }
  0x17   : > { %p107_p2 = scmp.ne.s32.totalorder %s902_s23, %s898_s0  ;;  %s1352_s30 = smov (%p59_p1, %s57_s30), 0 }
  0x18   : > { %1315 = sst [smem:[#allocation23_spill]] %s1352_s30  ;;  %p113_p4 = scmp.ne.s32.totalorder %s898_s0, %s894_s22 }
  0x19   : > { %p1029_p3 = por %p107_p2, %p76_p0  ;;  %s92_s8 = sld [smem:[#allocation3 + %s1352_s30]] }
  0x1a   : > { %p582_p5 = scmp.lt.s32.totalorder %s926_s29, 3  ;;  %s218_s9 = sand.u32 1, %s926_s29  }
  0x1b   : > { %s220_s10 = sand.u32 1, %s902_s23   ;;  %p542_p8 = scmp.ge.s32.totalorder %s926_s29, 1 }
  0x1c   : > { %s537_s11 = sshll.u32 %s220_s10, 7  ;;  %p1043_p6 = pnand %p582_p5, %p1029_p3 }
  0x1d   : > { %s553_s13 = scalar_select %p1029_p3, [#allocation3], [#allocation11] }
  0x1e   : > { %s222_s15 = scalar_lea.vmem [#allocation7], %s537_s11  ;;  %p263_p9 = scmp.lt.s32.totalorder %s926_s29, 4 }
  0x1f   : > { %s93_s14 = ssub.s32 %s91_s5, %s92_s8  ;;  %s1049_s16 = sshll.u32 %s222_s15, 4 }
  0x20   : > { %1318 = sst [smem:[#allocation24_spill]] %s1049_s16  ;;  %p98_p7 = scmp.eq.s32.totalorder %s93_s14, 0 }
  0x21   : > { %s554_s17 = scalar_select %p1029_p3, %s922_s28, 0 }
  0x22   : > { %s1056_s18 = scalar_select %p98_p7, %s902_s23, %s100_s6  }
  0x23   : > { %s1354_s13 = smov (!%p582_p5, %s553_s13), [#allocation13]  ;;  %s1356_s17 = smov (!%p582_p5, %s554_s17), 0 }
  0x24   : > { %1319 = sst [smem:[#allocation25_spill]] %s1056_s18  ;;  %p1064_p10 = pnand %p542_p8, %p263_p9 }
  0x25   : > { %s223_s10 = sld [smem:[%s1354_s13 + %s1356_s17]]  ;;  %s1069_s11 = sadd.s32 4294967295, %s926_s29  }
  0x26   : > { %s1321_s2 = sld [smem:[#allocation28_spill]]  ;;  %s532_s15 = sadd.s32 4294967294, %s926_s29  }
  0x27   : > { %s61_s18 = ssub.s32 %s922_s28, %s1352_s30  ;;  %s1081_s17 = scalar_lea.sflag [#allocation8], %s218_s9 }
  0x28   : > { %p1077_p11 = scmp.eq.s32.totalorder %s61_s18, 0  ;;  %p700_p13 = pneg %p1043_p6 }
  0x2b   : > { %s551_s8 = sshll.u32 %s223_s10, 7 }
  0x2c   : > { %s231_s6 = scalar_lea.hbm %s1321_s2, %s551_s8  ;;  %s703_s14 = scalar_lea.hbm %s1321_s2, 1024 }
  0x2d   : > { %s232_s16 = sshll.u32 %s231_s6, 4  ;;  %s233_s16 = int_to_ptr.hbm [resolvable:$true] %s232_s16 }
  0x2e   : > { %s696_s23 = sshra.s32 %s233_s16, 4  ;;  %s697_s23 = int_to_ptr.hbm [resolvable:$true] %s696_s23 }
  0x2f   : > { %s698_s4 = scalar_lea.hbm %s697_s23, 128  ;;  %p704_p3 = scmp.lt.s32.totalorder %s697_s23, %s1321_s2 }
  0x30   : > { %p699_p12 = scmp.ne.s32.totalorder %s697_s23, %s698_s4  ;;  %p705_p7 = scmp.lt.s32.totalorder %s703_s14, %s698_s4 }
  0x32   : > { %p701_p1 = pnand %p700_p13, %p699_p12  ;;  %p706_p8 = por %p705_p7, %p704_p3 }
  0x34   : > { %p702_p2 = pneg %p701_p1 }
  0x36   : > { %p707_p9 = pnand %p706_p8, %p702_p2 }
  0x38   : > { %710 = shalt.err (!%p707_p9)
}
  0x39   : > { %s929_s9 = smov 128   ;;  %s1323_s18 = sld [smem:[#allocation24_spill]] }
  0x3a   : > { %s930_s4 = smov 8   ;;  %s68_s10 = sadd.s32 1, %s914_s26 }
  0x3b   : > { %p75_p12 = scmp.ne.s32.totalorder %s914_s26, %s910_s25  ;;  %p81_p1 = scmp.ne.s32.totalorder %s910_s25, %s906_s24 }
  0x3c   : > { %s1102_s8 = scalar_select %p1077_p11, %s914_s26, %s68_s10  }
  0x3d   : > { %p1106_p13 = por %p76_p0, %p75_p12  ;;  %p82_p2 = scmp.eq.s32.totalorder %s1069_s11, 0 }
  0x3e   : > { %1325 = sst [smem:[#allocation26_spill]] %s1102_s8  ;;  %p171_p3 = scmp.eq.s32.totalorder %s1069_s11, 2 }
  0x3f   : > { %s1324_s23 = int_to_ptr.vmem [resolvable:$true] %s1323_s18  ;;  %p177_p7 = scmp.eq.s32.totalorder %s532_s15, 2 }
  0x40   : > { %572 = dma.hbm_to_vmem [thread:$0]  (!%p1043_p6), %s233_s16, 2048, %s1324_s23, %s1081_s17, %s929_s9, %s929_s9, %s930_s4  }
  0x41   : > { %s197_s12 = sand.u32 1, %s914_s26   ;;  %p1117_p6 = por %p82_p2, %p81_p1 }
  0x42   : > { %p1126_p11 = por %p113_p4, %p82_p2  ;;  %p1130_p8 = por %p171_p3, %p75_p12 }
  0x43   : > { %p1134_p9 = por %p177_p7, %p81_p1  ;;  %s535_s6 = sshll.u32 %s197_s12, 3 }
  0x44   : > { %s536_s22 = sshll.u32 %s922_s28, 3  ;;  %s1332_s1 = sld [smem:[#allocation27_spill]] }
  0x45   : > { %s1330_s15 = scalar_select %p1134_p9, 1, 0 }
  0x46   : > { %s201_s23 = scalar_lea.vmem [#allocation4], %s535_s6  ;;  %p565_p4 = pnand %p582_p5, %p1106_p13 }
  0x47   : > { %1331 = sst [smem:[#allocation24_spill]] %s1330_s15  ;;  %s211_s10 = sshll.u32 %s201_s23, 4  ;;  %s212_s10 = int_to_ptr.vmem [resolvable:$true] %s211_s10 }
  0x48   : > { %s198_s8 = scalar_lea.sflag [#allocation5], %s197_s12  ;;  %s123_s26 = sld [smem:[#allocation3 + %s922_s28]] }
  0x49   : > { %s124_s9 = sld [smem:[#allocation3 + %s1352_s30]]  ;;  %p137_p12 = scmp.ne.s32.totalorder %s890_s21, %s886_s20 }
  0x4a   : > { %s207_s4 = scalar_lea.hbm %s1332_s1, %s536_s22  ;;  %p143_p1 = scmp.ne.s32.totalorder %s886_s20, %s882_s19 }
  0x4b   : > { %s209_s2 = sshll.u32 %s207_s4, 4  ;;  %s246_s22 = sand.u32 1, %s890_s21   ;;  %s210_s2 = int_to_ptr.hbm [resolvable:$true] %s209_s2 }
  0x4c   : > { %567 = dma.hbm_to_vmem [thread:$0]  (!%p565_p4), %s210_s2, 128, %s212_s10, %s198_s8  }
  0x4d   : > { %p1154_p3 = por %p143_p1, %p82_p2  ;;  %p139_p7 = por %p137_p12, %p76_p0 }
  0x4e   : > { %s130_s14 = sadd.s32 1, %s890_s21  ;;  %s540_s4 = sshll.u32 %s246_s22, 3 }
  0x4f   : > { %s125_s18 = ssub.s32 %s123_s26, %s124_s9  ;;  %p1164_p4 = pnand %p582_p5, %p139_p7 }
  0x50   : > { %p128_p13 = scmp.eq.s32.totalorder %s125_s18, 0  ;;  %s248_s10 = scalar_lea.vmem [#allocation9], %s540_s4 }
  0x51   : > { %s556_s8 = scalar_select %p139_p7, [#allocation3], [#allocation12] }
  0x52   : > { %s1169_s12 = scalar_select %p128_p13, %s890_s21, %s130_s14  }
  0x53   : > { %s557_s19 = scalar_select %p139_p7, %s922_s28, 0 }
  0x54   : > { %s1358_s8 = smov (!%p582_p5, %s556_s8), [#allocation14]  ;;  %s258_s1 = sshll.u32 %s248_s10, 4  ;;  %s259_s1 = int_to_ptr.vmem [resolvable:$true] %s258_s1 }
  0x55   : > { %s1360_s19 = smov (!%p582_p5, %s557_s19), 0  ;;  %p760_p2 = pneg %p1164_p4 }
  0x56   : > { %s249_s23 = sld [smem:[%s1358_s8 + %s1360_s19]]  ;;  %s763_s4 = scalar_lea.hbm %s1300_s3, 64 }
  0x5c   : > { %s541_s26 = sshll.u32 %s249_s23, 3 }
  0x5d   : > { %s254_s18 = scalar_lea.hbm %s1300_s3, %s541_s26 }
  0x5e   : > { %s256_s30 = sshll.u32 %s254_s18, 4  ;;  %s257_s30 = int_to_ptr.hbm [resolvable:$true] %s256_s30 }
  0x5f   : > { %s756_s15 = sshra.s32 %s257_s30, 4  ;;  %s757_s15 = int_to_ptr.hbm [resolvable:$true] %s756_s15 }
  0x60   : > { %s758_s14 = scalar_lea.hbm %s757_s15, 8  ;;  %p764_p5 = scmp.lt.s32.totalorder %s757_s15, %s1300_s3 }
  0x61   : > { %p759_p0 = scmp.ne.s32.totalorder %s757_s15, %s758_s14  ;;  %p765_p7 = scmp.lt.s32.totalorder %s763_s4, %s758_s14 }
  0x63   : > { %p761_p12 = pnand %p760_p2, %p759_p0  ;;  %p766_p13 = por %p765_p7, %p764_p5 }
  0x65   : > { %p762_p1 = pneg %p761_p12 }
  0x67   : > { %p767_p9 = pnand %p766_p13, %p762_p1 }
  0x69   : > { %770 = shalt.err (!%p767_p9)
}
  0x6a   : > { %577 = dma.hbm_to_vmem [thread:$0]  (!%p1164_p4), %s257_s30, 128, %s259_s1, %s1081_s17  }
  0x6b   : > { %267 = sbr.rel (%p1064_p10) target bundleno = 284 (0x11c), region = 32  ;;  %s1193_s10 = sand.u32 (!%p1064_p10), 1, %s910_s25  }
  0x6c   : > { %s543_s28 = sshll.u32 (!%p1064_p10), %s1193_s10, 3  ;;  %s270_s15 = scalar_lea.sflag (!%p1064_p10), [#allocation5], %s1193_s10 }
  0x6d   : > { %s1199_s26 = scalar_lea.vmem (!%p1064_p10), [#allocation4], %s543_s28 }
  0x70   : > { %865 = dma.done.wait (%p1117_p6), %s270_s15, 128  }
  0x71   : > { %867 = vsyncadd (%p1117_p6), %s270_s15, 4294967168  ;;  %s279_s1 = sand.u32 1, %s1069_s11   ;;  %s281_s30 = sand.u32 1, %s898_s0  }
  0x72   : > { %s544_s5 = sshll.u32 %s281_s30, 7  ;;  %s280_s17 = scalar_lea.sflag [#allocation8], %s279_s1 }
  0x73   : > { %s1207_s2 = scalar_lea.vmem [#allocation7], %s544_s5 }
  0x74   : > { %869 = dma.done.wait (%p1126_p11), %s280_s17, 2048  }
  0x75   : > { %871 = vsyncadd (%p1126_p11), %s280_s17, 4294965248  ;;  %s291_s9 = sand.u32 1, %s886_s20  }
  0x76   : > { %s1214_s22 = sshll.u32 %s291_s9, 3 }
  0x77   : > { %s293_s16 = scalar_lea.vmem [#allocation9], %s1214_s22 }
  0x78   : > { %873 = dma.done.wait (%p1154_p3), %s280_s17, 128  }
  0x79   : > { %875 = vsyncadd (%p1154_p3), %s280_s17, 4294967168  ;;  %v354_v0 = vld [vmem:[%s1207_s2 + $0x78] sm:$0xff]  ;;  %v353_v1 = vld [vmem:[%s1207_s2 + $0x70] sm:$0xff]  ;;  %s548_s11 = sshll.u32 %s918_s27, 3  ;;  %s1335_s18 = sld [smem:[#allocation29_spill]] }
  0x7a   : > { %355 = vmatpush.msra.mxu0 %v354_v0  ;;  %v352_v2 = vld [vmem:[%s1207_s2 + $0x68] sm:$0xff]  ;;  %v351_v3 = vld [vmem:[%s1207_s2 + $0x60] sm:$0xff]  ;;  %v350_v4 = vld [vmem:[%s1207_s2 + $0x58] sm:$0xff]  ;;  %s326_s8 = scalar_lea.vmem [#allocation10], %s543_s28  ;;  %s378_s23 = scalar_lea.sflag [#allocation6], %s1193_s10 }
  0x7b   : > { %v349_v5 = vld [vmem:[%s1207_s2 + $0x50] sm:$0xff]  ;;  %v348_v6 = vld [vmem:[%s1207_s2 + $0x48] sm:$0xff]  ;;  %v347_v7 = vld [vmem:[%s1207_s2 + $0x40] sm:$0xff]  ;;  %s392_s4 = sshll.u32 %s326_s8, 4  ;;  %s393_s4 = int_to_ptr.vmem [resolvable:$true] %s392_s4 }
  0x7c   : > { %356 = vmatpush.msra.mxu0 %v353_v1  ;;  %v346_v8 = vld [vmem:[%s1207_s2 + $0x38] sm:$0xff]  ;;  %v345_v9 = vld [vmem:[%s1207_s2 + $0x30] sm:$0xff]  ;;  %v344_v10 = vld [vmem:[%s1207_s2 + $0x28] sm:$0xff] }
  0x7d   : > { %v343_v11 = vld [vmem:[%s1207_s2 + $0x20] sm:$0xff]  ;;  %v342_v12 = vld [vmem:[%s1207_s2 + $0x18] sm:$0xff]  ;;  %v341_v13 = vld [vmem:[%s1207_s2 + $0x10] sm:$0xff] }
  0x7e   : > { %357 = vmatpush.msra.mxu0 %v352_v2  ;;  %v340_v14 = vld [vmem:[%s1207_s2 + $0x8] sm:$0xff]  ;;  %v339_v15 = vld [vmem:[%s1207_s2] sm:$0xff]  ;;  %v338_v16 = vld [vmem:[%s1199_s26] sm:$0xff] }
  0x7f   : > { %s390_s14 = scalar_lea.hbm %s1335_s18, %s548_s11  ;;  %v683_v17 = vld [vmem:[%s293_s16] ss:$0 sm:$0xff]  ;;  %s806_s30 = scalar_lea.hbm %s1335_s18, 24 }
  0x80   : > { %358 = vmatpush.msra.mxu0 %v351_v3  ;;  %s394_s19 = sshll.u32 %s390_s14, 4  ;;  %s395_s19 = int_to_ptr.hbm [resolvable:$true] %s394_s19 }
  0x81   : > { %s800_s15 = sshra.s32 %s395_s19, 4  ;;  %s801_s15 = int_to_ptr.hbm [resolvable:$true] %s800_s15 }
  0x82   : > { %359 = vmatpush.msra.mxu0 %v350_v4  ;;  %s802_s27 = scalar_lea.hbm %s801_s15, 8  ;;  %p807_p9 = scmp.lt.s32.totalorder %s801_s15, %s1335_s18 }
  0x83   : > { %p803_p10 = scmp.ne.s32.totalorder %s801_s15, %s802_s27  ;;  %p808_p3 = scmp.lt.s32.totalorder %s806_s30, %s802_s27 }
  0x84   : > { %360 = vmatpush.msra.mxu0 %v349_v5 }
  0x85   : > { %p804_p6 = pnand %p803_p10, %p1130_p8  ;;  %p809_p4 = por %p808_p3, %p807_p9 }
  0x86   : > { %361 = vmatpush.msra.mxu0 %v348_v6 }
  0x87   : > { %p805_p11 = pneg %p804_p6 }
  0x88   : > { %362 = vmatpush.msra.mxu0 %v347_v7 }
  0x89   : > { %p810_p0 = pnand %p809_p4, %p805_p11 }
  0x8a   : > { %363 = vmatpush.msra.mxu0 %v346_v8 }
  0x8c   : > { %364 = vmatpush.msra.mxu0 %v345_v9 }
  0x8e   : > { %365 = vmatpush.msra.mxu0 %v344_v10 }
  0x90   : > { %366 = vmatpush.msra.mxu0 %v343_v11 }
  0x92   : > { %367 = vmatpush.msra.mxu0 %v342_v12 }
  0x94   : > { %368 = vmatpush.msra.mxu0 %v341_v13 }
  0x96   : > { %369 = vmatpush.msra.mxu0 %v340_v14 }
  0x98   : > { %370 = vmatpush.msra.mxu0 %v339_v15 }
  0x99   : > { %371 = vmatmul.f32.vlgmr.msra.gmra.mxu0 %v338_v16 }
 0x116   : > { %v372_v18 = vpop.f32.mrf.mxu0 }
 0x117   : > { %v375_v19 = vadd.f32 %v683_v17, %v372_v18 }
 0x119   : > { %376 = vst [vmem:[%s326_s8] sm:$0xff] %v375_v19 }
 0x11a   : > { %813 = shalt.err (!%p810_p0)
}
 0x11b   : > { %562 = dma.vmem_to_hbm [thread:$0]  (%p1130_p8), %s393_s4, 128, %s395_s19, %s378_s23  }
 0x11c PF: > { %s1336_s10 = sld [smem:[#allocation24_spill]]  ;;  %p583_p2 = scmp.ge.s32.totalorder %s926_s29, 2 }
 0x11d   : > { %s406_s17 = sand.u32 1, %s906_s24  }
 0x11e   : > { %s407_s2 = scalar_lea.sflag [#allocation6], %s406_s17 }
 0x122   : > { %p1337_p12 = scmp.ne.s32.totalorder %s1336_s10, 0 }
 0x124   : > { %p579_p1 = pnand %p583_p2, %p1337_p12 }
 0x126   : > { %p580_p5 = pneg %p579_p1 }
 0x128   : > { %877 = dma.done.wait (%p580_p5), %s407_s2, 128  }
 0x129   : > { %879 = vsyncadd (%p580_p5), %s407_s2, 4294967168  ;;  %s31_s29 = sadd.s32 1, %s926_s29   ;;  %s1338_s7 = sld [smem:[#allocation20_spill]] }
 0x12a   : > { %p28_p7 = scmp.ge.s32.totalorder %s31_s29, 5   ;;  %s1339_s23 = sld [smem:[#allocation25_spill]] }
 0x12b   : > { %s1340_s9 = sld [smem:[#allocation21_spill]]  ;;  %s1344_s19 = smov %s886_s20 }
 0x12c   : > { %s1341_s26 = sld [smem:[#allocation26_spill]]  ;;  %s1345_s20 = smov %s890_s21 }
 0x12d   : > { %s1342_s27 = sld [smem:[#allocation22_spill]]  ;;  %s1346_s21 = smov %s1169_s12 }
 0x12e   : > { %s1343_s28 = sld [smem:[#allocation23_spill]]  ;;  %s1347_s22 = smov %s898_s0 }
 0x12f   : > { %s1348_s0 = smov %s1338_s7  ;;  %s1349_s24 = smov %s910_s25 }
 0x130   :  { %30 = sbr.rel (!%p28_p7) target bundleno = 19 (0x13), region = 105 }
 0x131   : > { %s1350_s25 = smov %s1340_s9 }
 0x135   :  { %413 = vsyncpa [#allocation5], 1 }
 0x136   :  { %415 = vsyncpa [#allocation5 + $0x1], 1 }
 0x137   :  { %416 = vsyncpa [#allocation8], 1 }
 0x138   :  { %418 = vsyncpa [#allocation8 + $0x1], 1 }
 0x139   :  { %419 = vsyncpa [#allocation6], 1 }
 0x13a   :  { %421 = vsyncpa [#allocation6 + $0x1], 1 }

</bundles_post_ra>
